<compile_context>
chip_gen: v7x
topology: tpu7x:2x2x1
jax: 0.10.0
libtpu: 0.0.40
codegen_flags: <defaults>
</compile_context>

<pallas_src>
import functools
import math

import jax
import jax.numpy as jnp
from jax.experimental import pallas as pl
from jax.experimental.pallas import tpu as pltpu


def _round_up(x, m):
    return (x + m - 1) // m * m


# ----------------------------- Pallas kernel ------------------------------- #
def _residual_block_kernel(
    x_ref,         # (TB, C, L)   activations (store dtype)
    dproj_ref,     # (TB, C, 1)   diffusion_projection(diffusion_step), f32
    cond_ref,      # (TB, 1, L)   circularly padded conditioner
    wf_ref,        # (2C, Kpad)   fused [Wd_k0 | Wd_k1 | Wd_k2 | W_cond | 0-pad]
    b2_ref,        # (2C, 1)      b_dil + b_cond (f32)
    wo_ref,        # (2C, C)      output_projection weight
    bo_ref,        # (2C, 1)      output_projection bias (f32)
    out_res_ref,   # (TB, C, L)
    out_skip_ref,  # (TB, C, L)
    taps_ref,      # VMEM scratch (Kpad, TB*L), compute dtype
    *,
    dilation,      # static
    c_pad,         # static: sublane-aligned per-tap row stride (Cp)
):
    TB, C, L = x_ref.shape
    Kpad = taps_ref.shape[0]
    Cp = c_pad
    d = dilation
    cdt = taps_ref.dtype
    f32 = jnp.float32

    # Zero the taps rows the packing below never writes.  Their weight columns
    # are zero, but stale VMEM could hold NaN/Inf (0 * NaN = NaN), so they must
    # hold real zeros.  Only a handful of rows -> negligible cost per step.
    pad_rows = []
    if Cp > C:
        pad_rows += [(k * Cp + C, (k + 1) * Cp) for k in range(3)]
    if Kpad > 3 * Cp + 1:
        pad_rows.append((3 * Cp + 1, Kpad))
    for lo, hi in pad_rows:
        taps_ref[lo:hi, :] = jnp.zeros((hi - lo, taps_ref.shape[1]), cdt)

    # ---- pack taps: per batch, dilated circular conv (kernel=3) taps -------- #
    #   out[t] = Wd0 @ y[(t-d) % L] + Wd1 @ y[t] + Wd2 @ y[(t+d) % L]
    # built with static wrap-around slice stores (no host pad, no roll op).
    for b in range(TB):                       # static unroll over the batch tile
        col = b * L
        yb = (x_ref[b].astype(f32) + dproj_ref[b].astype(f32)).astype(cdt)  # (C, L)
        # tap 0: column t holds y[(t - d) mod L]
        taps_ref[0:C, col:col + d] = yb[:, L - d:]
        taps_ref[0:C, col + d:col + L] = yb[:, :L - d]
        # tap 1: center
        taps_ref[Cp:Cp + C, col:col + L] = yb
        # tap 2: column t holds y[(t + d) mod L]
        taps_ref[2 * Cp:2 * Cp + C, col:col + L - d] = yb[:, d:]
        taps_ref[2 * Cp:2 * Cp + C, col + L - d:col + L] = yb[:, :d]
        # conditioner row (1x1 conv with a single input channel)
        taps_ref[3 * Cp:3 * Cp + 1, col:col + L] = cond_ref[b].astype(cdt)

    # ---- fused dilated conv + conditioner projection: ONE MXU matmul -------- #
    y2 = jnp.dot(wf_ref[...], taps_ref[...],
                 preferred_element_type=f32) + b2_ref[...].astype(f32)  # (2C, TB*L)

    gate = y2[:C, :]
    filt = y2[C:, :]
    h = jax.nn.sigmoid(gate) * jnp.tanh(filt)                           # f32 (C, TB*L)

    # ---- output_projection (1x1 conv) + leaky_relu(0.4) --------------------- #
    o = jnp.dot(wo_ref[...], h.astype(cdt),
                preferred_element_type=f32) + bo_ref[...].astype(f32)   # (2C, TB*L)
    o = jnp.where(o >= 0, o, 0.4 * o)

    inv_sqrt2 = 1.0 / math.sqrt(2.0)
    for b in range(TB):                       # per-batch epilogue: residual + skip
        col = b * L
        x0 = x_ref[b].astype(f32)
        out_res_ref[b] = ((x0 + o[:C, col:col + L]) * inv_sqrt2).astype(out_res_ref.dtype)
        out_skip_ref[b] = o[C:, col:col + L].astype(out_skip_ref.dtype)


# ------------------------------- Wrapper ------------------------------------ #
def _choose_tb(B, L, target_lanes=512):
    """Pick a batch tile: divisor of B with TB*L >= target_lanes lanes, but keep
    >= 2 grid steps when B allows (v7x megacore needs >= 2 steps on the
    'parallel' axis)."""
    divisors = [t for t in range(1, B + 1) if B % t == 0]
    cands = [t for t in divisors if B // t >= 2] or divisors
    for t in cands:
        if t * L >= target_lanes:
            return t
    return cands[-1]


def residual_block_forward(x, conditioner, diffusion_step, params, dilation,
                           *, batch_tile=None, compute_dtype=None):
    """x: (B, C, L); conditioner: (B, 1, L-4); diffusion_step: (B, H)."""
    B, C, L = x.shape
    d = int(dilation)
    assert 1 <= d < L, "circular dilated conv requires 1 <= dilation < target_dim"
    store_dtype = x.dtype
    cdt = jnp.dtype(compute_dtype) if compute_dtype is not None else jnp.dtype(store_dtype)
    f32 = jnp.float32

    # TODO(synk): only the target_dim > 1 branch of the PyTorch module is
    # implemented here; target_dim == 1 degenerates to plain 1x1 convs.

    # sublane alignment of the per-tap row blocks inside the taps scratch
    align = 8 if cdt.itemsize >= 4 else 16
    Cp = _round_up(C, align)
    Kpad = _round_up(3 * Cp + 1, align)

    TB = int(batch_tile) if batch_tile is not None else _choose_tb(B, L)
    assert B % TB == 0, "batch_tile must divide the batch size"
    grid = (B // TB,)

    # ---- tiny host-side preprocessing (O(B*C) / O(B*L) work) ---------------- #
    # diffusion_projection (nn.Linear): one (B,H)@(H,C) matmul on the host,
    # streamed into the kernel as (B, C, 1) (no L-times replication).
    dproj = (diffusion_step.astype(f32) @ params['W_dp'].astype(f32).T
             + params['b_dp'].astype(f32))[:, :, None]                   # (B, C, 1)

    # conditioner_projection: circular pad by 2 of a kernel-1 conv grows the
    # length by 4; shapes only match when conditioner length == target_dim - 4.
    cond = conditioner
    cpad = jnp.concatenate([cond[..., -2:], cond, cond[..., :2]], axis=-1)  # (B,1,L)
    assert cpad.shape[-1] == L, "conditioner length must be target_dim - 4"

    # fused weight: columns [k*Cp : k*Cp+C] = dilated-conv tap k, column 3*Cp =
    # conditioner weight, everything else zero (matches the zeroed pad rows).
    Wd = params['W_dil'].astype(f32)                                     # (2C, C, 3)
    Wf = jnp.zeros((2 * C, Kpad), f32)
    for k in range(3):
        Wf = Wf.at[:, k * Cp:k * Cp + C].set(Wd[:, :, k])
    Wf = Wf.at[:, 3 * Cp].set(params['W_cond'].astype(f32)[:, 0, 0])
    Wf = Wf.astype(cdt)
    b2 = (params['b_dil'].astype(f32) + params['b_cond'].astype(f32))[:, None]  # (2C,1)
    Wo = params['W_out'].astype(f32)[:, :, 0].astype(cdt)                # (2C, C)
    bo = params['b_out'].astype(f32)[:, None]                            # (2C, 1)

    kernel = functools.partial(_residual_block_kernel, dilation=d, c_pad=Cp)

    batch_map = lambda i: (i, 0, 0)     # stream TB batches per grid step
    resident = lambda i: (0, 0)         # weights stay resident across the grid

    # VMEM footprint estimate; only raise the scoped limit when actually needed
    # (v7x has half the VMEM of v5e/v6e — re-derive batch_tile there first).
    isz = lambda dt: jnp.dtype(dt).itemsize
    blk_bytes = (TB * C * L * isz(store_dtype)             # x block
                 + TB * C * 4 + TB * L * isz(cpad.dtype)   # dproj + cond blocks
                 + 2 * TB * C * L * isz(store_dtype))      # two output blocks
    w_bytes = (2 * C * Kpad + 2 * C * C) * isz(cdt) + 4 * C * 4
    est = 2 * (blk_bytes + w_bytes) + Kpad * TB * L * isz(cdt)
    cp_kwargs = dict(dimension_semantics=("parallel",))    # megacore on v7x
    if est > 12 * 1024 * 1024:
        cp_kwargs["vmem_limit_bytes"] = int(min(2 * est, 64 * 1024 * 1024))

    out_res, out_skip = pl.pallas_call(
        kernel,
        out_shape=(jax.ShapeDtypeStruct((B, C, L), store_dtype),
                   jax.ShapeDtypeStruct((B, C, L), store_dtype)),
        grid=grid,
        in_specs=[
            pl.BlockSpec((TB, C, L), batch_map),           # x
            pl.BlockSpec((TB, C, 1), batch_map),           # diffusion projection
            pl.BlockSpec((TB, 1, L), batch_map),           # conditioner (padded)
            pl.BlockSpec((2 * C, Kpad), resident),         # fused conv+cond weight
            pl.BlockSpec((2 * C, 1), resident),            # fused bias
            pl.BlockSpec((2 * C, C), resident),            # output proj weight
            pl.BlockSpec((2 * C, 1), resident),            # output proj bias
        ],
        out_specs=(pl.BlockSpec((TB, C, L), batch_map),
                   pl.BlockSpec((TB, C, L), batch_map)),
        scratch_shapes=[pltpu.VMEM((Kpad, TB * L), cdt)],
        compiler_params=pltpu.CompilerParams(**cp_kwargs),
    )(x, dproj, cpad, Wf, b2, Wo, bo)

    return out_res, out_skip


# ------------------------ Pure-JAX reference (NCL) -------------------------- #
def reference_forward(x, conditioner, diffusion_step, p, dilation):
    x = x.astype(jnp.float32)
    conditioner = conditioner.astype(jnp.float32)
    diffusion_step = diffusion_step.astype(jnp.float32)
    B, C, L = x.shape
    d = dilation
    dproj = diffusion_step @ p['W_dp'].T + p['b_dp']        # (B, C)
    y = x + dproj[:, :, None]                               # (B, C, L)
    ypad = jnp.concatenate([y[..., L - d:], y, y[..., :d]], axis=-1)
    Wd = p['W_dil']
    dil = jnp.zeros((B, 2 * C, L), jnp.float32)
    for k in range(3):
        seg = ypad[..., k * d: k * d + L]
        dil = dil + jnp.einsum('oc,bcl->bol', Wd[:, :, k], seg)
    dil = dil + p['b_dil'][None, :, None]
    cpad = jnp.concatenate(
        [conditioner[..., -2:], conditioner, conditioner[..., :2]], axis=-1)
    cond = p['W_cond'][:, 0, 0][None, :, None] * cpad + p['b_cond'][None, :, None]
    y2 = dil + cond
    gate, filt = y2[:, :C, :], y2[:, C:, :]
    h = jax.nn.sigmoid(gate) * jnp.tanh(filt)
    o = jnp.einsum('oc,bcl->bol', p['W_out'][:, :, 0], h) + p['b_out'][None, :, None]
    o = jnp.where(o >= 0, o, 0.4 * o)
    res, skip = o[:, :C, :], o[:, C:, :]
    return (x + res) / math.sqrt(2.0), skip


# ------------------------------ Param init ---------------------------------- #
def init_params(key, hidden_size, residual_channels):
    C, H = residual_channels, hidden_size
    ks = jax.random.split(key, 8)

    def kaiming(k, shape, fan_in):
        return jax.random.normal(k, shape, jnp.float32) * math.sqrt(2.0 / fan_in)

    return {
        'W_dp': kaiming(ks[0], (C, H), H),
        'b_dp': jax.random.normal(ks[1], (C,), jnp.float32) * 0.01,
        'W_dil': kaiming(ks[2], (2 * C, C, 3), C * 3),
        'b_dil': jax.random.normal(ks[3], (2 * C,), jnp.float32) * 0.01,
        'W_cond': kaiming(ks[4], (2 * C, 1, 1), 1),
        'b_cond': jax.random.normal(ks[5], (2 * C,), jnp.float32) * 0.01,
        'W_out': kaiming(ks[6], (2 * C, C, 1), C),
        'b_out': jax.random.normal(ks[7], (2 * C,), jnp.float32) * 0.01,
    }


if __name__ == "__main__":
    key = jax.random.PRNGKey(0)

    def run_case(B, H, C, L, dilation, dtype, atol, rtol, seed_offset):
        kp, kx, kc, kd = jax.random.split(jax.random.fold_in(key, seed_offset), 4)
        params = init_params(kp, H, C)
        x = jax.random.normal(kx, (B, C, L), jnp.float32).astype(dtype)
        conditioner = jax.random.normal(kc, (B, 1, L - 4), jnp.float32).astype(dtype)
        diffusion_step = jax.random.normal(kd, (B, H), jnp.float32).astype(dtype)

        out_res, out_skip = residual_block_forward(
            x, conditioner, diffusion_step, params, dilation)
        jax.block_until_ready((out_res, out_skip))

        ref_res, ref_skip = reference_forward(
            x, conditioner, diffusion_step, params, dilation)
        assert out_res.shape == (B, C, L) and out_skip.shape == (B, C, L)
        assert out_res.dtype == dtype and out_skip.dtype == dtype
        err_r = jnp.max(jnp.abs(out_res.astype(jnp.float32) - ref_res))
        err_s = jnp.max(jnp.abs(out_skip.astype(jnp.float32) - ref_skip))
        assert jnp.allclose(out_res.astype(jnp.float32), ref_res,
                            atol=atol, rtol=rtol), f"res mismatch: {err_r}"
        assert jnp.allclose(out_skip.astype(jnp.float32), ref_skip,
                            atol=atol, rtol=rtol), f"skip mismatch: {err_s}"

    # main config: lane-dense output (L % 128 == 0), batch tile TB=4 -> grid=(2,)
    run_case(B=8, H=32, C=8, L=128, dilation=2, dtype=jnp.float32,
             atol=1e-3, rtol=1e-3, seed_offset=0)
    # bf16 activations: bf16 MXU operands + halved taps scratch, f32 accumulation
    run_case(B=8, H=32, C=8, L=128, dilation=4, dtype=jnp.bfloat16,
             atol=1e-1, rtol=1e-1, seed_offset=1)
    # small / unaligned shapes (L < 128, C < 8, larger dilation), TB=1 -> grid=(2,)
    run_case(B=2, H=16, C=4, L=16, dilation=5, dtype=jnp.float32,
             atol=1e-3, rtol=1e-3, seed_offset=2)

    print("KERNEL_OK")
</pallas_src>

<mosaic_0001>
module attributes {stable_mosaic.version = 11 : i64} {
  func.func @_residual_block_kernel(%arg0: i32, %arg1: memref<4x8x128xf32, #tpu.memory_space<vmem>>, %arg2: memref<4x8x1xf32, #tpu.memory_space<vmem>>, %arg3: memref<4x1x128xf32, #tpu.memory_space<vmem>>, %arg4: memref<16x32xf32, #tpu.memory_space<vmem>>, %arg5: memref<16x1xf32, #tpu.memory_space<vmem>>, %arg6: memref<16x8xf32, #tpu.memory_space<vmem>>, %arg7: memref<16x1xf32, #tpu.memory_space<vmem>>, %arg8: memref<4x8x128xf32, #tpu.memory_space<vmem>>, %arg9: memref<4x8x128xf32, #tpu.memory_space<vmem>>, %arg10: memref<32x512xf32, #tpu.memory_space<vmem>>) attributes {dimension_semantics = [#tpu.dimension_semantics<parallel>], iteration_bounds = array<i64: 2>, scalar_prefetch = 0 : i64, scratch_operands = 1 : i64, tpu.core_type = #tpu.core_type<tc>, window_params = [{transform_indices = @transform_0, window_bounds = array<i64: 4, 8, 128>}, {transform_indices = @transform_1, window_bounds = array<i64: 4, 8, 1>}, {transform_indices = @transform_2, window_bounds = array<i64: 4, 1, 128>}, {pipeline_mode = #tpu.pipeline_mode<synchronous>, transform_indices = @transform_3, window_bounds = array<i64: 16, 32>}, {pipeline_mode = #tpu.pipeline_mode<synchronous>, transform_indices = @transform_4, window_bounds = array<i64: 16, 1>}, {pipeline_mode = #tpu.pipeline_mode<synchronous>, transform_indices = @transform_5, window_bounds = array<i64: 16, 8>}, {pipeline_mode = #tpu.pipeline_mode<synchronous>, transform_indices = @transform_6, window_bounds = array<i64: 16, 1>}, {transform_indices = @transform_7, window_bounds = array<i64: 4, 8, 128>}, {transform_indices = @transform_8, window_bounds = array<i64: 4, 8, 128>}]} {
    %cst = arith.constant 0.000000e+00 : f32
    %0 = vector.broadcast %cst : f32 to vector<7x512xf32>
    %c25 = arith.constant 25 : index
    %c0 = arith.constant 0 : index
    %1 = vector.load %arg10[%c25, %c0] : memref<32x512xf32, #tpu.memory_space<vmem>>, vector<7x512xf32>
    tpu.vector_store %arg10[%c25, %c0], %0 {strides = array<i32>} : memref<32x512xf32, #tpu.memory_space<vmem>>, vector<7x512xf32>,
    %c0_0 = arith.constant 0 : index
    %c0_1 = arith.constant 0 : index
    %c0_2 = arith.constant 0 : index
    %2 = vector.load %arg1[%c0_0, %c0_1, %c0_2] : memref<4x8x128xf32, #tpu.memory_space<vmem>>, vector<1x8x128xf32>
    %3 = vector.shape_cast %2 : vector<1x8x128xf32> to vector<8x128xf32>
    %c0_3 = arith.constant 0 : index
    %c0_4 = arith.constant 0 : index
    %c0_5 = arith.constant 0 : index
    %4 = vector.load %arg2[%c0_3, %c0_4, %c0_5] : memref<4x8x1xf32, #tpu.memory_space<vmem>>, vector<1x8x1xf32>
    %5 = vector.shape_cast %4 : vector<1x8x1xf32> to vector<8x1xf32>
    %6 = vector.broadcast %5 : vector<8x1xf32> to vector<8x128xf32>
    %7 = arith.addf %3, %6 : vector<8x128xf32>
    %8 = vector.extract_strided_slice %7 {offsets = [0, 126], sizes = [8, 2], strides = [1, 1]} : vector<8x128xf32> to vector<8x2xf32>
    %c0_6 = arith.constant 0 : index
    %c0_7 = arith.constant 0 : index
    %9 = vector.load %arg10[%c0_6, %c0_7] : memref<32x512xf32, #tpu.memory_space<vmem>>, vector<8x2xf32>
    tpu.vector_store %arg10[%c0_6, %c0_7], %8 {strides = array<i32>} : memref<32x512xf32, #tpu.memory_space<vmem>>, vector<8x2xf32>,
    %10 = vector.extract_strided_slice %7 {offsets = [0, 0], sizes = [8, 126], strides = [1, 1]} : vector<8x128xf32> to vector<8x126xf32>
    %c0_8 = arith.constant 0 : index
    %c2 = arith.constant 2 : index
    %11 = vector.load %arg10[%c0_8, %c2] : memref<32x512xf32, #tpu.memory_space<vmem>>, vector<8x126xf32>
    tpu.vector_store %arg10[%c0_8, %c2], %10 {strides = array<i32>} : memref<32x512xf32, #tpu.memory_space<vmem>>, vector<8x126xf32>,
    %c8 = arith.constant 8 : index
    %c0_9 = arith.constant 0 : index
    %12 = vector.load %arg10[%c8, %c0_9] : memref<32x512xf32, #tpu.memory_space<vmem>>, vector<8x128xf32>
    tpu.vector_store %arg10[%c8, %c0_9], %7 {strides = array<i32>} : memref<32x512xf32, #tpu.memory_space<vmem>>, vector<8x128xf32>,
    %13 = vector.extract_strided_slice %7 {offsets = [0, 2], sizes = [8, 126], strides = [1, 1]} : vector<8x128xf32> to vector<8x126xf32>
    %c16 = arith.constant 16 : index
    %c0_10 = arith.constant 0 : index
    %14 = vector.load %arg10[%c16, %c0_10] : memref<32x512xf32, #tpu.memory_space<vmem>>, vector<8x126xf32>
    tpu.vector_store %arg10[%c16, %c0_10], %13 {strides = array<i32>} : memref<32x512xf32, #tpu.memory_space<vmem>>, vector<8x126xf32>,
    %15 = vector.extract_strided_slice %7 {offsets = [0, 0], sizes = [8, 2], strides = [1, 1]} : vector<8x128xf32> to vector<8x2xf32>
    %c16_11 = arith.constant 16 : index
    %c126 = arith.constant 126 : index
    %16 = vector.load %arg10[%c16_11, %c126] : memref<32x512xf32, #tpu.memory_space<vmem>>, vector<8x2xf32>
    tpu.vector_store %arg10[%c16_11, %c126], %15 {strides = array<i32>} : memref<32x512xf32, #tpu.memory_space<vmem>>, vector<8x2xf32>,
    %c0_12 = arith.constant 0 : index
    %c0_13 = arith.constant 0 : index
    %c0_14 = arith.constant 0 : index
    %17 = vector.load %arg3[%c0_12, %c0_13, %c0_14] : memref<4x1x128xf32, #tpu.memory_space<vmem>>, vector<1x1x128xf32>
    %18 = vector.shape_cast %17 : vector<1x1x128xf32> to vector<1x128xf32>
    %c24 = arith.constant 24 : index
    %c0_15 = arith.constant 0 : index
    %19 = vector.load %arg10[%c24, %c0_15] : memref<32x512xf32, #tpu.memory_space<vmem>>, vector<1x128xf32>
    tpu.vector_store %arg10[%c24, %c0_15], %18 {strides = array<i32>} : memref<32x512xf32, #tpu.memory_space<vmem>>, vector<1x128xf32>,
    %c1 = arith.constant 1 : index
    %c0_16 = arith.constant 0 : index
    %c0_17 = arith.constant 0 : index
    %20 = vector.load %arg1[%c1, %c0_16, %c0_17] : memref<4x8x128xf32, #tpu.memory_space<vmem>>, vector<1x8x128xf32>
    %21 = vector.shape_cast %20 : vector<1x8x128xf32> to vector<8x128xf32>
    %c1_18 = arith.constant 1 : index
    %c0_19 = arith.constant 0 : index
    %c0_20 = arith.constant 0 : index
    %22 = vector.load %arg2[%c1_18, %c0_19, %c0_20] : memref<4x8x1xf32, #tpu.memory_space<vmem>>, vector<1x8x1xf32>
    %23 = vector.shape_cast %22 : vector<1x8x1xf32> to vector<8x1xf32>
    %24 = vector.broadcast %23 : vector<8x1xf32> to vector<8x128xf32>
    %25 = arith.addf %21, %24 : vector<8x128xf32>
    %26 = vector.extract_strided_slice %25 {offsets = [0, 126], sizes = [8, 2], strides = [1, 1]} : vector<8x128xf32> to vector<8x2xf32>
    %c0_21 = arith.constant 0 : index
    %c128 = arith.constant 128 : index
    %27 = vector.load %arg10[%c0_21, %c128] : memref<32x512xf32, #tpu.memory_space<vmem>>, vector<8x2xf32>
    tpu.vector_store %arg10[%c0_21, %c128], %26 {strides = array<i32>} : memref<32x512xf32, #tpu.memory_space<vmem>>, vector<8x2xf32>,
    %28 = vector.extract_strided_slice %25 {offsets = [0, 0], sizes = [8, 126], strides = [1, 1]} : vector<8x128xf32> to vector<8x126xf32>
    %c0_22 = arith.constant 0 : index
    %c130 = arith.constant 130 : index
    %29 = vector.load %arg10[%c0_22, %c130] : memref<32x512xf32, #tpu.memory_space<vmem>>, vector<8x126xf32>
    tpu.vector_store %arg10[%c0_22, %c130], %28 {strides = array<i32>} : memref<32x512xf32, #tpu.memory_space<vmem>>, vector<8x126xf32>,
    %c8_23 = arith.constant 8 : index
    %c128_24 = arith.constant 128 : index
    %30 = vector.load %arg10[%c8_23, %c128_24] : memref<32x512xf32, #tpu.memory_space<vmem>>, vector<8x128xf32>
    tpu.vector_store %arg10[%c8_23, %c128_24], %25 {strides = array<i32>} : memref<32x512xf32, #tpu.memory_space<vmem>>, vector<8x128xf32>,
    %31 = vector.extract_strided_slice %25 {offsets = [0, 2], sizes = [8, 126], strides = [1, 1]} : vector<8x128xf32> to vector<8x126xf32>
    %c16_25 = arith.constant 16 : index
    %c128_26 = arith.constant 128 : index
    %32 = vector.load %arg10[%c16_25, %c128_26] : memref<32x512xf32, #tpu.memory_space<vmem>>, vector<8x126xf32>
    tpu.vector_store %arg10[%c16_25, %c128_26], %31 {strides = array<i32>} : memref<32x512xf32, #tpu.memory_space<vmem>>, vector<8x126xf32>,
    %33 = vector.extract_strided_slice %25 {offsets = [0, 0], sizes = [8, 2], strides = [1, 1]} : vector<8x128xf32> to vector<8x2xf32>
    %c16_27 = arith.constant 16 : index
    %c254 = arith.constant 254 : index
    %34 = vector.load %arg10[%c16_27, %c254] : memref<32x512xf32, #tpu.memory_space<vmem>>, vector<8x2xf32>
    tpu.vector_store %arg10[%c16_27, %c254], %33 {strides = array<i32>} : memref<32x512xf32, #tpu.memory_space<vmem>>, vector<8x2xf32>,
    %c1_28 = arith.constant 1 : index
    %c0_29 = arith.constant 0 : index
    %c0_30 = arith.constant 0 : index
    %35 = vector.load %arg3[%c1_28, %c0_29, %c0_30] : memref<4x1x128xf32, #tpu.memory_space<vmem>>, vector<1x1x128xf32>
    %36 = vector.shape_cast %35 : vector<1x1x128xf32> to vector<1x128xf32>
    %c24_31 = arith.constant 24 : index
    %c128_32 = arith.constant 128 : index
    %37 = vector.load %arg10[%c24_31, %c128_32] : memref<32x512xf32, #tpu.memory_space<vmem>>, vector<1x128xf32>
    tpu.vector_store %arg10[%c24_31, %c128_32], %36 {strides = array<i32>} : memref<32x512xf32, #tpu.memory_space<vmem>>, vector<1x128xf32>,
    %c2_33 = arith.constant 2 : index
    %c0_34 = arith.constant 0 : index
    %c0_35 = arith.constant 0 : index
    %38 = vector.load %arg1[%c2_33, %c0_34, %c0_35] : memref<4x8x128xf32, #tpu.memory_space<vmem>>, vector<1x8x128xf32>
    %39 = vector.shape_cast %38 : vector<1x8x128xf32> to vector<8x128xf32>
    %c2_36 = arith.constant 2 : index
    %c0_37 = arith.constant 0 : index
    %c0_38 = arith.constant 0 : index
    %40 = vector.load %arg2[%c2_36, %c0_37, %c0_38] : memref<4x8x1xf32, #tpu.memory_space<vmem>>, vector<1x8x1xf32>
    %41 = vector.shape_cast %40 : vector<1x8x1xf32> to vector<8x1xf32>
    %42 = vector.broadcast %41 : vector<8x1xf32> to vector<8x128xf32>
    %43 = arith.addf %39, %42 : vector<8x128xf32>
    %44 = vector.extract_strided_slice %43 {offsets = [0, 126], sizes = [8, 2], strides = [1, 1]} : vector<8x128xf32> to vector<8x2xf32>
    %c0_39 = arith.constant 0 : index
    %c256 = arith.constant 256 : index
    %45 = vector.load %arg10[%c0_39, %c256] : memref<32x512xf32, #tpu.memory_space<vmem>>, vector<8x2xf32>
    tpu.vector_store %arg10[%c0_39, %c256], %44 {strides = array<i32>} : memref<32x512xf32, #tpu.memory_space<vmem>>, vector<8x2xf32>,
    %46 = vector.extract_strided_slice %43 {offsets = [0, 0], sizes = [8, 126], strides = [1, 1]} : vector<8x128xf32> to vector<8x126xf32>
    %c0_40 = arith.constant 0 : index
    %c258 = arith.constant 258 : index
    %47 = vector.load %arg10[%c0_40, %c258] : memref<32x512xf32, #tpu.memory_space<vmem>>, vector<8x126xf32>
    tpu.vector_store %arg10[%c0_40, %c258], %46 {strides = array<i32>} : memref<32x512xf32, #tpu.memory_space<vmem>>, vector<8x126xf32>,
    %c8_41 = arith.constant 8 : index
    %c256_42 = arith.constant 256 : index
    %48 = vector.load %arg10[%c8_41, %c256_42] : memref<32x512xf32, #tpu.memory_space<vmem>>, vector<8x128xf32>
    tpu.vector_store %arg10[%c8_41, %c256_42], %43 {strides = array<i32>} : memref<32x512xf32, #tpu.memory_space<vmem>>, vector<8x128xf32>,
    %49 = vector.extract_strided_slice %43 {offsets = [0, 2], sizes = [8, 126], strides = [1, 1]} : vector<8x128xf32> to vector<8x126xf32>
    %c16_43 = arith.constant 16 : index
    %c256_44 = arith.constant 256 : index
    %50 = vector.load %arg10[%c16_43, %c256_44] : memref<32x512xf32, #tpu.memory_space<vmem>>, vector<8x126xf32>
    tpu.vector_store %arg10[%c16_43, %c256_44], %49 {strides = array<i32>} : memref<32x512xf32, #tpu.memory_space<vmem>>, vector<8x126xf32>,
    %51 = vector.extract_strided_slice %43 {offsets = [0, 0], sizes = [8, 2], strides = [1, 1]} : vector<8x128xf32> to vector<8x2xf32>
    %c16_45 = arith.constant 16 : index
    %c382 = arith.constant 382 : index
    %52 = vector.load %arg10[%c16_45, %c382] : memref<32x512xf32, #tpu.memory_space<vmem>>, vector<8x2xf32>
    tpu.vector_store %arg10[%c16_45, %c382], %51 {strides = array<i32>} : memref<32x512xf32, #tpu.memory_space<vmem>>, vector<8x2xf32>,
    %c2_46 = arith.constant 2 : index
    %c0_47 = arith.constant 0 : index
    %c0_48 = arith.constant 0 : index
    %53 = vector.load %arg3[%c2_46, %c0_47, %c0_48] : memref<4x1x128xf32, #tpu.memory_space<vmem>>, vector<1x1x128xf32>
    %54 = vector.shape_cast %53 : vector<1x1x128xf32> to vector<1x128xf32>
    %c24_49 = arith.constant 24 : index
    %c256_50 = arith.constant 256 : index
    %55 = vector.load %arg10[%c24_49, %c256_50] : memref<32x512xf32, #tpu.memory_space<vmem>>, vector<1x128xf32>
    tpu.vector_store %arg10[%c24_49, %c256_50], %54 {strides = array<i32>} : memref<32x512xf32, #tpu.memory_space<vmem>>, vector<1x128xf32>,
    %c3 = arith.constant 3 : index
    %c0_51 = arith.constant 0 : index
    %c0_52 = arith.constant 0 : index
    %56 = vector.load %arg1[%c3, %c0_51, %c0_52] : memref<4x8x128xf32, #tpu.memory_space<vmem>>, vector<1x8x128xf32>
    %57 = vector.shape_cast %56 : vector<1x8x128xf32> to vector<8x128xf32>
    %c3_53 = arith.constant 3 : index
    %c0_54 = arith.constant 0 : index
    %c0_55 = arith.constant 0 : index
    %58 = vector.load %arg2[%c3_53, %c0_54, %c0_55] : memref<4x8x1xf32, #tpu.memory_space<vmem>>, vector<1x8x1xf32>
    %59 = vector.shape_cast %58 : vector<1x8x1xf32> to vector<8x1xf32>
    %60 = vector.broadcast %59 : vector<8x1xf32> to vector<8x128xf32>
    %61 = arith.addf %57, %60 : vector<8x128xf32>
    %62 = vector.extract_strided_slice %61 {offsets = [0, 126], sizes = [8, 2], strides = [1, 1]} : vector<8x128xf32> to vector<8x2xf32>
    %c0_56 = arith.constant 0 : index
    %c384 = arith.constant 384 : index
    %63 = vector.load %arg10[%c0_56, %c384] : memref<32x512xf32, #tpu.memory_space<vmem>>, vector<8x2xf32>
    tpu.vector_store %arg10[%c0_56, %c384], %62 {strides = array<i32>} : memref<32x512xf32, #tpu.memory_space<vmem>>, vector<8x2xf32>,
    %64 = vector.extract_strided_slice %61 {offsets = [0, 0], sizes = [8, 126], strides = [1, 1]} : vector<8x128xf32> to vector<8x126xf32>
    %c0_57 = arith.constant 0 : index
    %c386 = arith.constant 386 : index
    %65 = vector.load %arg10[%c0_57, %c386] : memref<32x512xf32, #tpu.memory_space<vmem>>, vector<8x126xf32>
    tpu.vector_store %arg10[%c0_57, %c386], %64 {strides = array<i32>} : memref<32x512xf32, #tpu.memory_space<vmem>>, vector<8x126xf32>,
    %c8_58 = arith.constant 8 : index
    %c384_59 = arith.constant 384 : index
    %66 = vector.load %arg10[%c8_58, %c384_59] : memref<32x512xf32, #tpu.memory_space<vmem>>, vector<8x128xf32>
    tpu.vector_store %arg10[%c8_58, %c384_59], %61 {strides = array<i32>} : memref<32x512xf32, #tpu.memory_space<vmem>>, vector<8x128xf32>,
    %67 = vector.extract_strided_slice %61 {offsets = [0, 2], sizes = [8, 126], strides = [1, 1]} : vector<8x128xf32> to vector<8x126xf32>
    %c16_60 = arith.constant 16 : index
    %c384_61 = arith.constant 384 : index
    %68 = vector.load %arg10[%c16_60, %c384_61] : memref<32x512xf32, #tpu.memory_space<vmem>>, vector<8x126xf32>
    tpu.vector_store %arg10[%c16_60, %c384_61], %67 {strides = array<i32>} : memref<32x512xf32, #tpu.memory_space<vmem>>, vector<8x126xf32>,
    %69 = vector.extract_strided_slice %61 {offsets = [0, 0], sizes = [8, 2], strides = [1, 1]} : vector<8x128xf32> to vector<8x2xf32>
    %c16_62 = arith.constant 16 : index
    %c510 = arith.constant 510 : index
    %70 = vector.load %arg10[%c16_62, %c510] : memref<32x512xf32, #tpu.memory_space<vmem>>, vector<8x2xf32>
    tpu.vector_store %arg10[%c16_62, %c510], %69 {strides = array<i32>} : memref<32x512xf32, #tpu.memory_space<vmem>>, vector<8x2xf32>,
    %c3_63 = arith.constant 3 : index
    %c0_64 = arith.constant 0 : index
    %c0_65 = arith.constant 0 : index
    %71 = vector.load %arg3[%c3_63, %c0_64, %c0_65] : memref<4x1x128xf32, #tpu.memory_space<vmem>>, vector<1x1x128xf32>
    %72 = vector.shape_cast %71 : vector<1x1x128xf32> to vector<1x128xf32>
    %c24_66 = arith.constant 24 : index
    %c384_67 = arith.constant 384 : index
    %73 = vector.load %arg10[%c24_66, %c384_67] : memref<32x512xf32, #tpu.memory_space<vmem>>, vector<1x128xf32>
    tpu.vector_store %arg10[%c24_66, %c384_67], %72 {strides = array<i32>} : memref<32x512xf32, #tpu.memory_space<vmem>>, vector<1x128xf32>,
    %c0_68 = arith.constant 0 : index
    %c0_69 = arith.constant 0 : index
    %74 = vector.load %arg4[%c0_68, %c0_69] : memref<16x32xf32, #tpu.memory_space<vmem>>, vector<16x32xf32>
    %c0_70 = arith.constant 0 : index
    %c0_71 = arith.constant 0 : index
    %75 = vector.load %arg10[%c0_70, %c0_71] : memref<32x512xf32, #tpu.memory_space<vmem>>, vector<32x512xf32>
    %cst_72 = arith.constant dense<0.000000e+00> : vector<16x512xf32>
    %76 = tpu.matmul %74, %75, %cst_72 {dimension_numbers = #tpu.dot_dimension_numbers<[1], [0], [0], [1], [0, 0, 1, 1], [], []>} : vector<16x32xf32>, vector<32x512xf32>, vector<16x512xf32> -> vector<16x512xf32>
    %c0_73 = arith.constant 0 : index
    %c0_74 = arith.constant 0 : index
    %77 = vector.load %arg5[%c0_73, %c0_74] : memref<16x1xf32, #tpu.memory_space<vmem>>, vector<16x1xf32>
    %78 = vector.broadcast %77 : vector<16x1xf32> to vector<16x512xf32>
    %79 = arith.addf %76, %78 : vector<16x512xf32>
    %80 = vector.extract_strided_slice %79 {offsets = [0, 0], sizes = [8, 512], strides = [1, 1]} : vector<16x512xf32> to vector<8x512xf32>
    %81 = vector.extract_strided_slice %79 {offsets = [8, 0], sizes = [8, 512], strides = [1, 1]} : vector<16x512xf32> to vector<8x512xf32>
    %82 = arith.negf %80 : vector<8x512xf32>
    %83 = math.exp %82 : vector<8x512xf32>
    %cst_75 = arith.constant 1.000000e+00 : f32
    %84 = vector.broadcast %cst_75 : f32 to vector<8x512xf32>
    %85 = arith.addf %84, %83 : vector<8x512xf32>
    %86 = arith.divf %84, %85 : vector<8x512xf32>
    %87 = math.tanh %81 : vector<8x512xf32>
    %88 = arith.mulf %86, %87 : vector<8x512xf32>
    %c0_76 = arith.constant 0 : index
    %c0_77 = arith.constant 0 : index
    %89 = vector.load %arg6[%c0_76, %c0_77] : memref<16x8xf32, #tpu.memory_space<vmem>>, vector<16x8xf32>
    %cst_78 = arith.constant dense<0.000000e+00> : vector<16x512xf32>
    %90 = tpu.matmul %89, %88, %cst_78 {dimension_numbers = #tpu.dot_dimension_numbers<[1], [0], [0], [1], [0, 0, 1, 1], [], []>} : vector<16x8xf32>, vector<8x512xf32>, vector<16x512xf32> -> vector<16x512xf32>
    %c0_79 = arith.constant 0 : index
    %c0_80 = arith.constant 0 : index
    %91 = vector.load %arg7[%c0_79, %c0_80] : memref<16x1xf32, #tpu.memory_space<vmem>>, vector<16x1xf32>
    %92 = vector.broadcast %91 : vector<16x1xf32> to vector<16x512xf32>
    %93 = arith.addf %90, %92 : vector<16x512xf32>
    %cst_81 = arith.constant 0.000000e+00 : f32
    %94 = vector.broadcast %cst_81 : f32 to vector<16x512xf32>
    %95 = arith.cmpf oge, %93, %94 : vector<16x512xf32>
    %cst_82 = arith.constant 4.000000e-01 : f32
    %96 = vector.broadcast %cst_82 : f32 to vector<16x512xf32>
    %97 = arith.mulf %96, %93 : vector<16x512xf32>
    %98 = arith.select %95, %93, %97 : vector<16x512xi1>, vector<16x512xf32>
    %c0_83 = arith.constant 0 : index
    %c0_84 = arith.constant 0 : index
    %c0_85 = arith.constant 0 : index
    %99 = vector.load %arg1[%c0_83, %c0_84, %c0_85] : memref<4x8x128xf32, #tpu.memory_space<vmem>>, vector<1x8x128xf32>
    %100 = vector.shape_cast %99 : vector<1x8x128xf32> to vector<8x128xf32>
    %101 = vector.extract_strided_slice %98 {offsets = [0, 0], sizes = [8, 128], strides = [1, 1]} : vector<16x512xf32> to vector<8x128xf32>
    %102 = arith.addf %100, %101 : vector<8x128xf32>
    %cst_86 = arith.constant 0.707106769 : f32
    %103 = vector.broadcast %cst_86 : f32 to vector<8x128xf32>
    %104 = arith.mulf %102, %103 : vector<8x128xf32>
    %c0_87 = arith.constant 0 : index
    %c0_88 = arith.constant 0 : index
    %c0_89 = arith.constant 0 : index
    %105 = vector.load %arg8[%c0_87, %c0_88, %c0_89] : memref<4x8x128xf32, #tpu.memory_space<vmem>>, vector<1x8x128xf32>
    %106 = vector.shape_cast %105 : vector<1x8x128xf32> to vector<8x128xf32>
    %107 = vector.shape_cast %104 : vector<8x128xf32> to vector<1x8x128xf32>
    tpu.vector_store %arg8[%c0_87, %c0_88, %c0_89], %107 {strides = array<i32>} : memref<4x8x128xf32, #tpu.memory_space<vmem>>, vector<1x8x128xf32>,
    %108 = vector.extract_strided_slice %98 {offsets = [8, 0], sizes = [8, 128], strides = [1, 1]} : vector<16x512xf32> to vector<8x128xf32>
    %c0_90 = arith.constant 0 : index
    %c0_91 = arith.constant 0 : index
    %c0_92 = arith.constant 0 : index
    %109 = vector.load %arg9[%c0_90, %c0_91, %c0_92] : memref<4x8x128xf32, #tpu.memory_space<vmem>>, vector<1x8x128xf32>
    %110 = vector.shape_cast %109 : vector<1x8x128xf32> to vector<8x128xf32>
    %111 = vector.shape_cast %108 : vector<8x128xf32> to vector<1x8x128xf32>
    tpu.vector_store %arg9[%c0_90, %c0_91, %c0_92], %111 {strides = array<i32>} : memref<4x8x128xf32, #tpu.memory_space<vmem>>, vector<1x8x128xf32>,
    %c1_93 = arith.constant 1 : index
    %c0_94 = arith.constant 0 : index
    %c0_95 = arith.constant 0 : index
    %112 = vector.load %arg1[%c1_93, %c0_94, %c0_95] : memref<4x8x128xf32, #tpu.memory_space<vmem>>, vector<1x8x128xf32>
    %113 = vector.shape_cast %112 : vector<1x8x128xf32> to vector<8x128xf32>
    %114 = vector.extract_strided_slice %98 {offsets = [0, 128], sizes = [8, 128], strides = [1, 1]} : vector<16x512xf32> to vector<8x128xf32>
    %115 = arith.addf %113, %114 : vector<8x128xf32>
    %cst_96 = arith.constant 0.707106769 : f32
    %116 = vector.broadcast %cst_96 : f32 to vector<8x128xf32>
    %117 = arith.mulf %115, %116 : vector<8x128xf32>
    %c1_97 = arith.constant 1 : index
    %c0_98 = arith.constant 0 : index
    %c0_99 = arith.constant 0 : index
    %118 = vector.load %arg8[%c1_97, %c0_98, %c0_99] : memref<4x8x128xf32, #tpu.memory_space<vmem>>, vector<1x8x128xf32>
    %119 = vector.shape_cast %118 : vector<1x8x128xf32> to vector<8x128xf32>
    %120 = vector.shape_cast %117 : vector<8x128xf32> to vector<1x8x128xf32>
    tpu.vector_store %arg8[%c1_97, %c0_98, %c0_99], %120 {strides = array<i32>} : memref<4x8x128xf32, #tpu.memory_space<vmem>>, vector<1x8x128xf32>,
    %121 = vector.extract_strided_slice %98 {offsets = [8, 128], sizes = [8, 128], strides = [1, 1]} : vector<16x512xf32> to vector<8x128xf32>
    %c1_100 = arith.constant 1 : index
    %c0_101 = arith.constant 0 : index
    %c0_102 = arith.constant 0 : index
    %122 = vector.load %arg9[%c1_100, %c0_101, %c0_102] : memref<4x8x128xf32, #tpu.memory_space<vmem>>, vector<1x8x128xf32>
    %123 = vector.shape_cast %122 : vector<1x8x128xf32> to vector<8x128xf32>
    %124 = vector.shape_cast %121 : vector<8x128xf32> to vector<1x8x128xf32>
    tpu.vector_store %arg9[%c1_100, %c0_101, %c0_102], %124 {strides = array<i32>} : memref<4x8x128xf32, #tpu.memory_space<vmem>>, vector<1x8x128xf32>,
    %c2_103 = arith.constant 2 : index
    %c0_104 = arith.constant 0 : index
    %c0_105 = arith.constant 0 : index
    %125 = vector.load %arg1[%c2_103, %c0_104, %c0_105] : memref<4x8x128xf32, #tpu.memory_space<vmem>>, vector<1x8x128xf32>
    %126 = vector.shape_cast %125 : vector<1x8x128xf32> to vector<8x128xf32>
    %127 = vector.extract_strided_slice %98 {offsets = [0, 256], sizes = [8, 128], strides = [1, 1]} : vector<16x512xf32> to vector<8x128xf32>
    %128 = arith.addf %126, %127 : vector<8x128xf32>
    %cst_106 = arith.constant 0.707106769 : f32
    %129 = vector.broadcast %cst_106 : f32 to vector<8x128xf32>
    %130 = arith.mulf %128, %129 : vector<8x128xf32>
    %c2_107 = arith.constant 2 : index
    %c0_108 = arith.constant 0 : index
    %c0_109 = arith.constant 0 : index
    %131 = vector.load %arg8[%c2_107, %c0_108, %c0_109] : memref<4x8x128xf32, #tpu.memory_space<vmem>>, vector<1x8x128xf32>
    %132 = vector.shape_cast %131 : vector<1x8x128xf32> to vector<8x128xf32>
    %133 = vector.shape_cast %130 : vector<8x128xf32> to vector<1x8x128xf32>
    tpu.vector_store %arg8[%c2_107, %c0_108, %c0_109], %133 {strides = array<i32>} : memref<4x8x128xf32, #tpu.memory_space<vmem>>, vector<1x8x128xf32>,
    %134 = vector.extract_strided_slice %98 {offsets = [8, 256], sizes = [8, 128], strides = [1, 1]} : vector<16x512xf32> to vector<8x128xf32>
    %c2_110 = arith.constant 2 : index
    %c0_111 = arith.constant 0 : index
    %c0_112 = arith.constant 0 : index
    %135 = vector.load %arg9[%c2_110, %c0_111, %c0_112] : memref<4x8x128xf32, #tpu.memory_space<vmem>>, vector<1x8x128xf32>
    %136 = vector.shape_cast %135 : vector<1x8x128xf32> to vector<8x128xf32>
    %137 = vector.shape_cast %134 : vector<8x128xf32> to vector<1x8x128xf32>
    tpu.vector_store %arg9[%c2_110, %c0_111, %c0_112], %137 {strides = array<i32>} : memref<4x8x128xf32, #tpu.memory_space<vmem>>, vector<1x8x128xf32>,
    %c3_113 = arith.constant 3 : index
    %c0_114 = arith.constant 0 : index
    %c0_115 = arith.constant 0 : index
    %138 = vector.load %arg1[%c3_113, %c0_114, %c0_115] : memref<4x8x128xf32, #tpu.memory_space<vmem>>, vector<1x8x128xf32>
    %139 = vector.shape_cast %138 : vector<1x8x128xf32> to vector<8x128xf32>
    %140 = vector.extract_strided_slice %98 {offsets = [0, 384], sizes = [8, 128], strides = [1, 1]} : vector<16x512xf32> to vector<8x128xf32>
    %141 = arith.addf %139, %140 : vector<8x128xf32>
    %cst_116 = arith.constant 0.707106769 : f32
    %142 = vector.broadcast %cst_116 : f32 to vector<8x128xf32>
    %143 = arith.mulf %141, %142 : vector<8x128xf32>
    %c3_117 = arith.constant 3 : index
    %c0_118 = arith.constant 0 : index
    %c0_119 = arith.constant 0 : index
    %144 = vector.load %arg8[%c3_117, %c0_118, %c0_119] : memref<4x8x128xf32, #tpu.memory_space<vmem>>, vector<1x8x128xf32>
    %145 = vector.shape_cast %144 : vector<1x8x128xf32> to vector<8x128xf32>
    %146 = vector.shape_cast %143 : vector<8x128xf32> to vector<1x8x128xf32>
    tpu.vector_store %arg8[%c3_117, %c0_118, %c0_119], %146 {strides = array<i32>} : memref<4x8x128xf32, #tpu.memory_space<vmem>>, vector<1x8x128xf32>,
    %147 = vector.extract_strided_slice %98 {offsets = [8, 384], sizes = [8, 128], strides = [1, 1]} : vector<16x512xf32> to vector<8x128xf32>
    %c3_120 = arith.constant 3 : index
    %c0_121 = arith.constant 0 : index
    %c0_122 = arith.constant 0 : index
    %148 = vector.load %arg9[%c3_120, %c0_121, %c0_122] : memref<4x8x128xf32, #tpu.memory_space<vmem>>, vector<1x8x128xf32>
    %149 = vector.shape_cast %148 : vector<1x8x128xf32> to vector<8x128xf32>
    %150 = vector.shape_cast %147 : vector<8x128xf32> to vector<1x8x128xf32>
    tpu.vector_store %arg9[%c3_120, %c0_121, %c0_122], %150 {strides = array<i32>} : memref<4x8x128xf32, #tpu.memory_space<vmem>>, vector<1x8x128xf32>,
    return
  }
  func.func @transform_0(%arg0: i32) -> (i32, i32, i32) {
    %c0_i32 = arith.constant 0 : i32
    %c0_i32_0 = arith.constant 0 : i32
    %c0_i32_1 = arith.constant 0 : i32
    return %arg0, %c0_i32, %c0_i32_0 : i32, i32, i32
  }
  func.func @transform_1(%arg0: i32) -> (i32, i32, i32) {
    %c0_i32 = arith.constant 0 : i32
    %c0_i32_0 = arith.constant 0 : i32
    %c0_i32_1 = arith.constant 0 : i32
    return %arg0, %c0_i32, %c0_i32_0 : i32, i32, i32
  }
  func.func @transform_2(%arg0: i32) -> (i32, i32, i32) {
    %c0_i32 = arith.constant 0 : i32
    %c0_i32_0 = arith.constant 0 : i32
    %c0_i32_1 = arith.constant 0 : i32
    return %arg0, %c0_i32, %c0_i32_0 : i32, i32, i32
  }
  func.func @transform_3(%arg0: i32) -> (i32, i32) {
    %c0_i32 = arith.constant 0 : i32
    %c0_i32_0 = arith.constant 0 : i32
    %c0_i32_1 = arith.constant 0 : i32
    return %c0_i32, %c0_i32_0 : i32, i32
  }
  func.func @transform_4(%arg0: i32) -> (i32, i32) {
    %c0_i32 = arith.constant 0 : i32
    %c0_i32_0 = arith.constant 0 : i32
    %c0_i32_1 = arith.constant 0 : i32
    return %c0_i32, %c0_i32_0 : i32, i32
  }
  func.func @transform_5(%arg0: i32) -> (i32, i32) {
    %c0_i32 = arith.constant 0 : i32
    %c0_i32_0 = arith.constant 0 : i32
    %c0_i32_1 = arith.constant 0 : i32
    return %c0_i32, %c0_i32_0 : i32, i32
  }
  func.func @transform_6(%arg0: i32) -> (i32, i32) {
    %c0_i32 = arith.constant 0 : i32
    %c0_i32_0 = arith.constant 0 : i32
    %c0_i32_1 = arith.constant 0 : i32
    return %c0_i32, %c0_i32_0 : i32, i32
  }
  func.func @transform_7(%arg0: i32) -> (i32, i32, i32) {
    %c0_i32 = arith.constant 0 : i32
    %c0_i32_0 = arith.constant 0 : i32
    %c0_i32_1 = arith.constant 0 : i32
    return %arg0, %c0_i32, %c0_i32_0 : i32, i32, i32
  }
  func.func @transform_8(%arg0: i32) -> (i32, i32, i32) {
    %c0_i32 = arith.constant 0 : i32
    %c0_i32_0 = arith.constant 0 : i32
    %c0_i32_1 = arith.constant 0 : i32
    return %arg0, %c0_i32, %c0_i32_0 : i32, i32, i32
  }
}

</mosaic_0001>

<bundles_post_ra>
// kernel: tpu_custom_call.1
= control target key start
LH: loop header
LB: loop body
LE: loop exit
PB: predicated region body
PF: predicated region fallthrough
CT: control target
= control target key end

     0   :  { %s1574_s0 = inlined_call_operand.vmem [shape: f32[8,8,128], index: 0, kind: input, shape index: {}]   ;;  %s1575_s1 = inlined_call_operand.vmem [shape: f32[8,8,1], index: 1, kind: input, shape index: {}]   ;;  %s1576_s2 = inlined_call_operand.vmem [shape: f32[8,1,128], index: 2, kind: input, shape index: {}]   ;;  %s1577_s3 = inlined_call_operand.vmem [shape: f32[16,32], index: 3, kind: input, shape index: {}]   ;;  %s1578_s4 = inlined_call_operand.vmem [shape: f32[16,1], index: 4, kind: input, shape index: {}]   ;;  %s1579_s5 = inlined_call_operand.vmem [shape: f32[16,8], index: 5, kind: input, shape index: {}]   ;;  %s1580_s6 = inlined_call_operand.vmem [shape: f32[16,1], index: 6, kind: input, shape index: {}]   ;;  %s1581_s7 = inlined_call_operand.hbm [shape: f32[8,8,128], index: 7, kind: output, shape index: {0}]   ;;  %s1582_s8 = inlined_call_operand.hbm [shape: f32[8,8,128], index: 8, kind: output, shape index: {1}]  }
   0x1   :  { %1583 = sst [smem:[#allocation9_spill]] %s1574_s0 }
   0x2   :  { %14 = vsyncpa [#allocation4], 0 }
   0x3   :  { %16 = vsyncpa [#allocation4 + $0x1], 0 }
   0x4   :  { %17 = vsyncpa [#allocation6], 0 }
   0x5   :  { %19 = vsyncpa [#allocation6 + $0x1], 0  ;;  %s1355_s27 = smov 0   ;;  %s1357_s28 = smov 0  }
   0x6   :  { %s1359_s29 = smov 0   ;;  %s1361_s30 = smov 0  }
   0x7 LB: > { %s1376_s9 = sadd.s32 4294967295, %s1300_s30   ;;  %s1063_s10 = sadd.s32 4294967294, %s1300_s30   ;;  %s1300_s30 = sphi %s1361_s30, %s1590_s30   ;;  %s1296_s29 = sphi %s1359_s29, %s1589_s29   ;;  %s1292_s28 = sphi %s1357_s28, %s1588_s28   ;;  %s1288_s27 = sphi %s1355_s27, %s1587_s27  }
   0x8   : > { %s1380_s11 = sadd.s32 1, %s1300_s30   ;;  %s194_s12 = sadd.s32 1, %s1296_s29 }
   0x9   : > { %s191_s13 = ssub.s32 %s1300_s30, %s1380_s11  ;;  %p204_p0 = scmp.ne.s32.totalorder %s1296_s29, %s1292_s28 }
   0xa   : > { %p192_p1 = scmp.eq.s32.totalorder %s191_s13, 0  ;;  %p205_p2 = scmp.eq.s32.totalorder %s1376_s9, 1 }
   0xb   : > { %p210_p3 = scmp.ne.s32.totalorder %s1292_s28, %s1288_s27  ;;  %p211_p4 = scmp.eq.s32.totalorder %s1063_s10, 1 }
   0xc   : > { %s1391_s14 = scalar_select %p192_p1, %s1296_s29, %s194_s12  }
   0xd   : > { %p1393_p5 = por %p205_p2, %p204_p0  ;;  %p1397_p6 = por %p211_p4, %p210_p3 }
   0xe   : > { %p1066_p7 = scmp.ge.s32.totalorder %s1300_s30, 1  ;;  %p293_p8 = scmp.lt.s32.totalorder %s1300_s30, 3 }
  0x10   : > { %p294_p9 = pnand %p1066_p7, %p293_p8 }
  0x11   : > { %s1069_s17 = sshll.u32 (!%p294_p9), %s1376_s9, 2  ;;  %v1302_v0 = vmov (!%p294_p9), 0   ;;  %s1586_s0 = sld [smem:[#allocation9_spill]] (!%p294_p9)  ;;  %v1303_v11 = vmov (!%p294_p9), 0.0   ;;  %v483_v22 = vld [vmem:[%s1578_s4] sm:$0xff] (!%p294_p9)  ;;  %v484_v23 = vld [vmem:[%s1578_s4 + $0x8] sm:$0xff] (!%p294_p9) }
  0x12   : > { %297 = sbr.rel (%p294_p9) target bundleno = 811 (0x32b), region = 48  ;;  %1181 = vset.pattern.permute.xlu1 (!%p294_p9), %v1302_v0  ;;  %1180 = vset.pattern.permute.xlu0 (!%p294_p9), %v1302_v0  ;;  %p342_p10 = scmp.lt.s32.totalorder (!%p294_p9), %s1069_s17, 7  ;;  %361 = vst [vmem:[#allocation2 + $0x68] sm:$0xfe] (!%p294_p9), %v1303_v11  ;;  %360 = vst [vmem:[#allocation2 + $0x60] sm:$0xfe] (!%p294_p9), %v1303_v11 }
  0x13   : > { %362 = vst [vmem:[#allocation2 + $0x70] sm:$0xfe] (!%p294_p9), %v1303_v11  ;;  %363 = vst [vmem:[#allocation2 + $0x78] sm:$0xfe] (!%p294_p9), %v1303_v11  ;;  %566 = vmatprep.mubr.f32.mxu0 (!%p294_p9), %v1303_v11  ;;  %643 = vmatprep.mubr.f32.mxu1 (!%p294_p9), %v1303_v11  ;;  %s1304_s12 = smov (!%p294_p9), 2   ;;  %s1305_s13 = smov (!%p294_p9), 126  }
  0x14   : > { %v690_v24 = vld [vmem:[%s1580_s6] sm:$0xff] (!%p294_p9)  ;;  %v691_v25 = vld [vmem:[%s1580_s6 + $0x8] sm:$0xff] (!%p294_p9)  ;;  %vm376_vm0 = vcmask (!%p294_p9), 15360   ;;  %vm378_vm1 = vcmask (!%p294_p9), 1047568   ;;  %vm384_vm2 = vcmask (!%p294_p9), 1031168   ;;  %vm386_vm3 = vcmask (!%p294_p9), 1048560  }
  0x15   : > { %v465_v52 = vld [vmem:[%s1577_s3] sm:$0xff] (!%p294_p9)  ;;  %vm495_vm4 = vcmask (!%p294_p9), 261120   ;;  %v466_v55 = vld [vmem:[%s1577_s3 + $0x8] sm:$0xff] (!%p294_p9)  ;;  %vm702_vm5 = vcmask (!%p294_p9), 64512   ;;  %s1474_s20 = sand.u32 (!%p294_p9), 1, %s1292_s28   ;;  %s1112_s25 = sshll.u32 (!%p294_p9), %s1376_s9, 9 }
  0x16   : > { %s914_s19 = scalar_lea.sflag (!%p294_p9), [#allocation4], %s1474_s20  ;;  %s1306_s9 = smov (!%p294_p9), [#allocation3]  }
  0x19   : > { %s1592_s17 = smov (!%p342_p10, %s1069_s17), 7 }
  0x1a   : > { %s1070_s18 = sshll.u32 %s1592_s17, 3  ;;  %s356_s21 = scalar_lea.vmem %s1576_s2, %s1592_s17 }
  0x1b   : > { %s351_s24 = scalar_lea.vmem %s1575_s1, %s1070_s18  ;;  %v388_v1 = vld [vmem:[%s356_s21] sm:$0x1]  ;;  %v1076_v2 = vld [vmem:[%s356_s21 + $0x1] sm:$0x1]  ;;  %v1079_v3 = vld [vmem:[%s356_s21 + $0x2] sm:$0x1]  ;;  %s345_s10 = scalar_lea.vmem %s1586_s0, %s1070_s18 }
  0x1c   : > { %389 = vst [vmem:[#allocation2 + $0x60] sm:$0x1] %v388_v1  ;;  %v1075_v4 = vld [vmem:[%s351_s24 + $0x8] sm:$0xff]  ;;  %414 = vst [vmem:[#allocation2 + $0x68] sm:$0x1] %v1076_v2  ;;  %v365_v6 = vld [vmem:[%s351_s24] sm:$0xff]  ;;  %s1499_s18 = scalar_lea.hbm %s1582_s8, %s1112_s25 }
  0x1d   : > { %439 = vst [vmem:[#allocation2 + $0x70] sm:$0x1] %v1079_v3  ;;  %v1082_v5 = vld [vmem:[%s356_s21 + $0x3] sm:$0x1]  ;;  %396 = vperm.xlu0 %1180, %v1075_v4   ;;  %368 = vperm.xlu1 %1181, %v365_v6   ;;  %v1081_v7 = vld [vmem:[%s351_s24 + $0x18] sm:$0xff]  ;;  %v1078_v8 = vld [vmem:[%s351_s24 + $0x10] sm:$0xff] }
  0x1e   : > { %464 = vst [vmem:[#allocation2 + $0x78] sm:$0x1] %v1082_v5  ;;  %v1413_v9 = vld [vmem:[%s345_s10 + $0x8] sm:$0xff]  ;;  %v1415_v10 = vld [vmem:[%s345_s10] sm:$0xff]  ;;  %v1425_v16 = vld [vmem:[%s345_s10 + $0x18] sm:$0xff]  ;;  %s1067_s21 = sshll.u32 %s1474_s20, 5 }
  0x1f   : > { %v1427_v17 = vld [vmem:[%s345_s10 + $0x10] sm:$0xff]  ;;  %s1479_s22 = scalar_lea.vmem [#allocation5], %s1067_s21  ;;  %s333_s24 = scalar_lea.vmem [#allocation3], %s1067_s21 }
  0x20   : > { %s948_s23 = sshll.u32 %s1479_s22, 4  ;;  %s932_s26 = sshll.u32 %s333_s24, 4  ;;  %s1485_s23 = int_to_ptr.vmem [resolvable:$true] %s948_s23  ;;  %s1494_s26 = int_to_ptr.vmem [resolvable:$true] %s932_s26 }
  0x21   : > { %446 = vperm.xlu0 %1180, %v1081_v7   ;;  %421 = vperm.xlu1 %1181, %v1078_v8   ;;  %s1206_s21 = scalar_lea.vmem %s1494_s26, 512  ;;  %s1210_s10 = sshll.u32 %s1306_s9, 4  ;;  %s1211_s10 = int_to_ptr.vmem [resolvable:$false] %s1210_s10 }
  0x22   : > { %p1207_p11 = scmp.ne.s32.totalorder %s1494_s26, %s1206_s21  ;;  %s1212_s0 = scalar_lea.vmem %s1211_s10, 1024 }
  0x23   : > { %v480_v39 = vld [vmem:[#allocation2 + $0x68] sm:$0xff]  ;;  %v479_v45 = vld [vmem:[#allocation2 + $0x60] sm:$0xff]  ;;  %p1213_p0 = scmp.lt.s32.totalorder %s1494_s26, %s1211_s10  ;;  %p1214_p1 = scmp.lt.s32.totalorder %s1212_s0, %s1206_s21 }
  0x24   : > { %v481_v51 = vld [vmem:[#allocation2 + $0x70] sm:$0xff]  ;;  %p1208_p12 = pnand %p1207_p11, %p1393_p5 }
  0x25   : > { %v482_v46 = vld [vmem:[#allocation2 + $0x78] sm:$0xff]  ;;  %p1215_p2 = por %p1214_p1, %p1213_p0 }
  0x26   : > { %p1209_p13 = pneg %p1208_p12 }
  0x28   : > { %p1216_p3 = pnand %p1215_p2, %p1209_p13 }
  0x9c   : > { %v397_v12 = vpop.permute.xlu0 %396  ;;  %v369_v13 = vpop.permute.xlu1 %368 }
  0x9d   : > { %v399_v14 = vadd.f32 %v1413_v9, %v397_v12  ;;  %v371_v15 = vadd.f32 %v369_v13, %v1415_v10 }
  0x9f   : > { %401 = vrot.lane.b32.xlu0 %v399_v14, %s1304_s12 }
  0xa0   : > { %v447_v18 = vpop.permute.xlu0 %446  ;;  %v422_v19 = vpop.permute.xlu1 %421 }
  0xa1   : > { %v449_v20 = vadd.f32 %v1425_v16, %v447_v18  ;;  %v424_v21 = vadd.f32 %v1427_v17, %v422_v19 }
  0xa3   : > { %451 = vrot.lane.b32.xlu1 %v449_v20, %s1304_s12  ;;  %373 = vrot.lane.b32.xlu0 %v371_v15, %s1304_s12 }
  0xa7   : > { %426 = vrot.lane.b32.xlu1 %v424_v21, %s1304_s12  ;;  %407 = vrot.lane.b32.xlu0 %v399_v14, %s1305_s13  ;;  %s1492_s12 = scalar_lea.hbm %s1581_s7, %s1112_s25 }
  0xab   : > { %457 = vrot.lane.b32.xlu1 %v449_v20, %s1305_s13  ;;  %381 = vrot.lane.b32.xlu0 %v371_v15, %s1305_s13 }
  0xaf   : > { %432 = vrot.lane.b32.xlu1 %v424_v21, %s1305_s13  ;;  %487 = vperm.xlu0 %1180, %v483_v22  }
  0xb3   : > { %492 = vperm.xlu1 %1181, %v484_v23   ;;  %694 = vperm.xlu0 %1180, %v690_v24  }
  0xb7   : > { %699 = vperm.xlu1 %1181, %v691_v25  }
 0x111   : > { %v402_v26 = vpop.permute.xlu0 %401 }
 0x112   : > { %404 = vst.msk [vmem:[#allocation2 + $0x8] sm:$0xff] %vm376_vm0, %v402_v26 }
 0x113   : > { %405 = vst.msk [vmem:[#allocation2 + $0x8] sm:$0xff] %vm378_vm1, %v402_v26 }
 0x115   : > { %v452_v27 = vpop.permute.xlu1 %451  ;;  %v374_v28 = vpop.permute.xlu0 %373 }
 0x116   : > { %454 = vst.msk [vmem:[#allocation2 + $0x18] sm:$0xff] %vm376_vm0, %v452_v27  ;;  %377 = vst.msk [vmem:[#allocation2] sm:$0xff] %vm376_vm0, %v374_v28 }
 0x117   : > { %455 = vst.msk [vmem:[#allocation2 + $0x18] sm:$0xff] %vm378_vm1, %v452_v27  ;;  %379 = vst.msk [vmem:[#allocation2] sm:$0xff] %vm378_vm1, %v374_v28 }
 0x119   : > { %v427_v29 = vpop.permute.xlu1 %426  ;;  %v408_v30 = vpop.permute.xlu0 %407 }
 0x11a   : > { %429 = vst.msk [vmem:[#allocation2 + $0x10] sm:$0xff] %vm376_vm0, %v427_v29  ;;  %v468_v31 = vld [vmem:[#allocation2 + $0x8] sm:$0xff] }
 0x11b   : > { %410 = vst.msk [vmem:[#allocation2 + $0x48] sm:$0xff] %vm384_vm2, %v408_v30  ;;  %v1114_v32 = vpack.c.bf16 %v399_v14, %v468_v31 }
 0x11c   : > { %430 = vst.msk [vmem:[#allocation2 + $0x10] sm:$0xff] %vm378_vm1, %v427_v29 }
 0x11d   : > { %411 = vst.msk [vmem:[#allocation2 + $0x48] sm:$0xff] %vm386_vm3, %v408_v30  ;;  %v458_v33 = vpop.permute.xlu1 %457  ;;  %1115 = vmatprep.subr.bf16.mxu0 %v1114_v32  ;;  %v382_v34 = vpop.permute.xlu0 %381 }
 0x11e   : > { %460 = vst.msk [vmem:[#allocation2 + $0x58] sm:$0xff] %vm384_vm2, %v458_v33  ;;  %385 = vst.msk [vmem:[#allocation2 + $0x40] sm:$0xff] %vm384_vm2, %v382_v34  ;;  %v470_v35 = vld [vmem:[#allocation2 + $0x18] sm:$0xff]  ;;  %v467_v36 = vld [vmem:[#allocation2] sm:$0xff] }
 0x11f   : > { %461 = vst.msk [vmem:[#allocation2 + $0x58] sm:$0xff] %vm386_vm3, %v458_v33  ;;  %387 = vst.msk [vmem:[#allocation2 + $0x40] sm:$0xff] %vm386_vm3, %v382_v34  ;;  %v1122_v37 = vpack.c.bf16 %v449_v20, %v470_v35  ;;  %v1116_v38 = vpack.c.bf16 %v371_v15, %v467_v36  ;;  %v688_v35 = vld [vmem:[%s1579_s5] sm:$0xff] }
 0x121   : > { %1123 = vmatprep.subr.bf16.mxu1 %v1122_v37  ;;  %v433_v40 = vpop.permute.xlu1 %432  ;;  %1117 = vmatpush1.bf16.msra.mxu0 %v1116_v38 }
 0x122   : > { %435 = vst.msk [vmem:[#allocation2 + $0x50] sm:$0xff] %vm384_vm2, %v433_v40 }
 0x123   : > { %v469_v42 = vld [vmem:[#allocation2 + $0x10] sm:$0xff]  ;;  %436 = vst.msk [vmem:[#allocation2 + $0x50] sm:$0xff] %vm386_vm3, %v433_v40  ;;  %v689_v40 = vld [vmem:[%s1579_s5 + $0x8] sm:$0xff] }
 0x124   : > { %v476_v41 = vld [vmem:[#allocation2 + $0x48] sm:$0xff]  ;;  %v1124_v44 = vpack.c.bf16 %v424_v21, %v469_v42 }
 0x125   : > { %v1118_v43 = vpack.c.bf16 %v480_v39, %v476_v41 }
 0x126   : > { %1125 = vmatpush1.bf16.msra.mxu1 %v1124_v44  ;;  %v475_v47 = vld [vmem:[#allocation2 + $0x40] sm:$0xff]  ;;  %v478_v48 = vld [vmem:[#allocation2 + $0x58] sm:$0xff] }
 0x127   : > { %1119 = vmatprep.subr.bf16.mxu0 %v1118_v43  ;;  %v1120_v49 = vpack.c.bf16 %v479_v45, %v475_v47  ;;  %v1126_v50 = vpack.c.bf16 %v482_v46, %v478_v48 }
 0x129   : > { %1121 = vmatpush1.bf16.msra.mxu0 %v1120_v49  ;;  %1127 = vmatprep.subr.bf16.mxu1 %v1126_v50 }
 0x12a   : > { %v477_v53 = vld [vmem:[#allocation2 + $0x50] sm:$0xff] }
 0x12b   : > { %v1128_v54 = vpack.c.bf16 %v481_v51, %v477_v53 }
 0x12c   : > { %1083 = vmatmul.mubr.msk.f32.vlgmr.msra.gmra.mrb[0].mxu0 %vm495_vm4, %v465_v52 }
 0x12d   : > { %1129 = vmatpush1.bf16.msra.mxu1 %v1128_v54  ;;  %572 = vmatprep.mubr.f32.mxu0 %v1303_v11 }
 0x12e   : > { %v488_v56 = vpop.permute.xlu0 %487 }
 0x130   : > { %1084 = vmatmul.mubr.msk.f32.gmra.mrb[2].mxu0 %vm495_vm4, %v466_v55  ;;  %1085 = vmatmul.mubr.msk.f32.vlgmr.msra.gmra.mrb[0].mxu1 %vm495_vm4, %v465_v52 }
 0x131   : > { %649 = vmatprep.mubr.f32.mxu1 %v1303_v11  ;;  %773 = vmatprep.mubr.f32.mxu0 %v1303_v11 }
 0x132   : > { %v493_v12 = vpop.permute.xlu1 %492  ;;  %v695_v41 = vpop.permute.xlu0 %694 }
 0x134   : > { %1086 = vmatmul.mubr.msk.f32.gmra.mrb[2].mxu1 %vm495_vm4, %v466_v55 }
 0x135   : > { %850 = vmatprep.mubr.f32.mxu1 %v1303_v11 }
 0x136   : > { %v700_v46 = vpop.permute.xlu1 %699 }
 0x1ff   : > { %v568_v57 = vpop.f32.mrb[0].mxu0 }
 0x200   : > { %v569_v58 = vadd.f32 %v568_v57, %v488_v56  ;;  %v570_v59 = vpop.f32.mrb[1].mxu0 }
 0x201   : > { %v571_v60 = vadd.f32 %v570_v59, %v488_v56 }
 0x202   : > { %v1087_v61 = vmul.f32 -1.442695, %v569_v58 }
 0x203   : > { %v1088_v62 = vmul.f32 -1.442695, %v571_v60  ;;  %v574_v63 = vpop.f32.mrb[2].mxu0  ;;  %v645_v0 = vpop.f32.mrb[0].mxu1 }
 0x204   : > { %1182 = vpow2.f32 %v1087_v61  ;;  %v646_v1 = vadd.f32 %v645_v0, %v488_v56  ;;  %v576_v2 = vpop.f32.mrb[3].mxu0  ;;  %v647_v3 = vpop.f32.mrb[1].mxu1  ;;  %v575_v13 = vadd.f32 %v574_v63, %v493_v12 }
 0x205   : > { %1184 = vpow2.f32 %v1088_v62  ;;  %v648_v4 = vadd.f32 %v647_v3, %v488_v56  ;;  %v577_v14 = vadd.f32 %v576_v2, %v493_v12 }
 0x206   : > { %v1089_v5 = vmul.f32 -1.442695, %v646_v1 }
 0x207   : > { %v1090_v6 = vmul.f32 -1.442695, %v648_v4  ;;  %v651_v7 = vpop.f32.mrb[2].mxu1 }
 0x208   : > { %1186 = vpow2.f32 %v1089_v5  ;;  %v653_v8 = vpop.f32.mrb[3].mxu1  ;;  %v652_v20 = vadd.f32 %v651_v7, %v493_v12 }
 0x209   : > { %1188 = vpow2.f32 %v1090_v6  ;;  %v654_v22 = vadd.f32 %v653_v8, %v493_v12 }
 0x20a   : > { %1190 = vtanh.f32 %v575_v13 }
 0x20b   : > { %1192 = vtanh.f32 %v577_v14 }
 0x20e   : > { %v1183_v15 = vpop.eup %1182 }
 0x20f   : > { %v1185_v18 = vpop.eup %1184  ;;  %v668_v19 = vadd.f32 1.0, %v1183_v15 }
 0x210   : > { %v669_v21 = vadd.f32 1.0, %v1185_v18 }
 0x211   : > { %1194 = vrcp.f32 %v668_v19 }
 0x212   : > { %v1187_v23 = vpop.eup %1186  ;;  %1196 = vrcp.f32 %v669_v21 }
 0x213   : > { %v1189_v24 = vpop.eup %1188  ;;  %v670_v25 = vadd.f32 1.0, %v1187_v23  ;;  %1198 = vtanh.f32 %v652_v20 }
 0x214   : > { %v671_v26 = vadd.f32 1.0, %v1189_v24  ;;  %1200 = vtanh.f32 %v654_v22  ;;  %v1191_v27 = vpop.eup %1190 }
 0x215   : > { %1202 = vrcp.f32 %v670_v25  ;;  %v1193_v28 = vpop.eup %1192 }
 0x216   : > { %1204 = vrcp.f32 %v671_v26 }
 0x21b   : > { %v1195_v29 = vpop.eup %1194 }
 0x21c   : > { %v1197_v30 = vpop.eup %1196  ;;  %v684_v31 = vmul.f32 %v1195_v29, %v1191_v27 }
 0x21d   : > { %v1199_v32 = vpop.eup %1198  ;;  %v685_v33 = vmul.f32 %v1197_v30, %v1193_v28 }
 0x21e   : > { %v1201_v34 = vpop.eup %1200 }
 0x21f   : > { %v1203_v36 = vpop.eup %1202  ;;  %709 = vmatprep.subr.mxu0 %v685_v33 }
 0x220   : > { %v1205_v37 = vpop.eup %1204  ;;  %710 = vmatpush1.msra.mxu0 %v684_v31  ;;  %v686_v38 = vmul.f32 %v1203_v36, %v1199_v32 }
 0x221   : > { %1091 = vmatmul.mubr.msk.f32.vlgmr.msra.gmra.mrb[4].mxu0 %vm702_vm5, %v688_v35  ;;  %v687_v39 = vmul.f32 %v1205_v37, %v1201_v34 }
 0x222   : > { %779 = vmatprep.mubr.f32.mxu0 %v1303_v11 }
 0x223   : > { %786 = vmatprep.subr.mxu1 %v687_v39 }
 0x224   : > { %787 = vmatpush1.msra.mxu1 %v686_v38 }
 0x225   : > { %1092 = vmatmul.mubr.msk.f32.gmra.mrb[6].mxu0 %vm702_vm5, %v689_v40  ;;  %1093 = vmatmul.mubr.msk.f32.vlgmr.msra.gmra.mrb[4].mxu1 %vm702_vm5, %v688_v35 }
 0x226   : > { %856 = vmatprep.mubr.f32.mxu1 %v1303_v11 }
 0x229   : > { %1094 = vmatmul.mubr.msk.f32.gmra.mrb[6].mxu1 %vm702_vm5, %v689_v40 }
 0x2f4   : > { %v775_v42 = vpop.f32.mrb[4].mxu0 }
 0x2f5   : > { %v776_v43 = vadd.f32 %v775_v42, %v695_v41  ;;  %v777_v44 = vpop.f32.mrb[5].mxu0 }
 0x2f6   : > { %v778_v45 = vadd.f32 %v777_v44, %v695_v41 }
 0x2f7   : > { %vm863_vm6 = vcmp.ge.f32.partialorder %v776_v43, 0.0  ;;  %v871_v47 = vmul.f32 0.4, %v776_v43 }
 0x2f8   : > { %vm864_vm7 = vcmp.ge.f32.partialorder %v778_v45, 0.0  ;;  %v872_v48 = vmul.f32 0.4, %v778_v45  ;;  %v781_v49 = vpop.f32.mrb[6].mxu0  ;;  %v852_v50 = vpop.f32.mrb[4].mxu1 }
 0x2f9   : > { %v879_v51 = vsel %vm863_vm6, %v776_v43, %v871_v47  ;;  %v782_v52 = vadd.f32 %v781_v49, %v700_v46  ;;  %v853_v11 = vadd.f32 %v852_v50, %v695_v41  ;;  %v783_v53 = vpop.f32.mrb[7].mxu0  ;;  %v854_v54 = vpop.f32.mrb[5].mxu1 }
 0x2fa   : > { %v888_v55 = vadd.f32 %v879_v51, %v1415_v10  ;;  %v880_v56 = vsel %vm864_vm7, %v778_v45, %v872_v48  ;;  %v784_v57 = vadd.f32 %v783_v53, %v700_v46  ;;  %v855_v58 = vadd.f32 %v854_v54, %v695_v41 }
 0x2fb   : > { %v893_v59 = vadd.f32 %v1413_v9, %v880_v56  ;;  %vm867_vm8 = vcmp.ge.f32.partialorder %v782_v52, 0.0  ;;  %v875_v60 = vmul.f32 0.4, %v782_v52  ;;  %vm865_vm9 = vcmp.ge.f32.partialorder %v853_v11, 0.0 }
 0x2fc   : > { %v889_v61 = vmul.f32 0.70710677, %v888_v55  ;;  %v873_v62 = vmul.f32 0.4, %v853_v11  ;;  %vm868_vm10 = vcmp.ge.f32.partialorder %v784_v57, 0.0  ;;  %vm866_vm11 = vcmp.ge.f32.partialorder %v855_v58, 0.0 }
 0x2fd   : > { %v894_v63 = vmul.f32 0.70710677, %v893_v59  ;;  %v883_v10 = vsel %vm867_vm8, %v782_v52, %v875_v60  ;;  %v876_v0 = vmul.f32 0.4, %v784_v57  ;;  %v874_v1 = vmul.f32 0.4, %v855_v58 }
 0x2fe   : > { %890 = vst [vmem:[%s333_s24] sm:$0xff] %v889_v61  ;;  %891 = vst [vmem:[%s1479_s22] sm:$0xff] %v883_v10  ;;  %v881_v9 = vsel %vm865_vm9, %v853_v11, %v873_v62  ;;  %v858_v2 = vpop.f32.mrb[6].mxu1 }
 0x2ff   : > { %1096 = vst [vmem:[%s333_s24 + $0x8] sm:$0xff] %v894_v63  ;;  %v900_v3 = vadd.f32 %v1427_v17, %v881_v9  ;;  %v884_v4 = vsel %vm868_vm10, %v784_v57, %v876_v0  ;;  %v882_v5 = vsel %vm866_vm11, %v855_v58, %v874_v1  ;;  %v859_v6 = vadd.f32 %v858_v2, %v700_v46  ;;  %v860_v7 = vpop.f32.mrb[7].mxu1 }
 0x300   : > { %1097 = vst [vmem:[%s1479_s22 + $0x8] sm:$0xff] %v884_v4  ;;  %v907_v8 = vadd.f32 %v1425_v16, %v882_v5  ;;  %v861_v12 = vadd.f32 %v860_v7, %v700_v46 }
 0x301   : > { %v901_v13 = vmul.f32 0.70710677, %v900_v3  ;;  %vm869_vm12 = vcmp.ge.f32.partialorder %v859_v6, 0.0  ;;  %v877_v14 = vmul.f32 0.4, %v859_v6 }
 0x302   : > { %v908_v17 = vmul.f32 0.70710677, %v907_v8  ;;  %vm870_vm13 = vcmp.ge.f32.partialorder %v861_v12, 0.0  ;;  %v878_v15 = vmul.f32 0.4, %v861_v12 }
 0x303   : > { %1099 = vst [vmem:[%s333_s24 + $0x10] sm:$0xff] %v901_v13  ;;  %v885_v16 = vsel %vm869_vm12, %v859_v6, %v877_v14 }
 0x304   : > { %1102 = vst [vmem:[%s333_s24 + $0x18] sm:$0xff] %v908_v17  ;;  %1100 = vst [vmem:[%s1479_s22 + $0x10] sm:$0xff] %v885_v16  ;;  %v886_v18 = vsel %vm870_vm13, %v861_v12, %v878_v15 }
 0x305   : > { %1103 = vst [vmem:[%s1479_s22 + $0x18] sm:$0xff] %v886_v18 }
 0x306   : > { %1219 = shalt.err (!%p1216_p3)
}
 0x307   : > { %s1220_s22 = scalar_lea.hbm %s1492_s12, 512  ;;  %s1224_s13 = scalar_lea.hbm %s1581_s7, 1024 }
 0x308   : > { %p1221_p4 = scmp.ne.s32.totalorder %s1492_s12, %s1220_s22  ;;  %p1225_p9 = scmp.lt.u32.totalorder %s1492_s12, %s1581_s7 }
 0x309   : > { %p1226_p10 = scmp.lt.u32.totalorder %s1224_s13, %s1220_s22  ;;  %p1228_p12 = scmp.lt.u32.totalorder %s1220_s22, %s1492_s12 }
 0x30a   : > { %p1222_p7 = pnand %p1221_p4, %p1393_p5 }
 0x30b   : > { %p1227_p11 = por %p1226_p10, %p1225_p9 }
 0x30c   : > { %p1223_p8 = pneg %p1222_p7 }
 0x30d   : > { %p1229_p13 = por %p1228_p12, %p1227_p11 }
 0x30f   : > { %p1230_p0 = pnand %p1229_p13, %p1223_p8 }
 0x311   : > { %1233 = shalt.err (!%p1230_p0)
}
 0x312   : > { %s1307_s0 = smov 128   ;;  %s1308_s21 = smov 8  }
 0x313   : > { %1130 = dma.vmem_to_hbm [thread:$0]  (%p1393_p5), %s1494_s26, 512, %s1492_s12, %s914_s19, %s1307_s0, %s1307_s0, %s1308_s21  }
 0x314   : > { %s919_s10 = scalar_lea.sflag [#allocation6], %s1474_s20  ;;  %s1234_s22 = scalar_lea.vmem %s1485_s23, 512 }
 0x315   : > { %p1235_p1 = scmp.ne.s32.totalorder %s1485_s23, %s1234_s22  ;;  %s1309_s24 = smov [#allocation5]  }
 0x316   : > { %s1238_s25 = sshll.u32 %s1309_s24, 4  ;;  %s1239_s25 = int_to_ptr.vmem [resolvable:$false] %s1238_s25 }
 0x317   : > { %p1236_p2 = pnand %p1235_p1, %p1393_p5  ;;  %s1240_s13 = scalar_lea.vmem %s1239_s25, 1024 }
 0x318   : > { %p1241_p4 = scmp.lt.s32.totalorder %s1485_s23, %s1239_s25  ;;  %p1242_p7 = scmp.lt.s32.totalorder %s1240_s13, %s1234_s22 }
 0x319   : > { %p1237_p3 = pneg %p1236_p2 }
 0x31a   : > { %p1243_p8 = por %p1242_p7, %p1241_p4 }
 0x31c   : > { %p1244_p9 = pnand %p1243_p8, %p1237_p3 }
 0x31e   : > { %1247 = shalt.err (!%p1244_p9)
}
 0x31f   : > { %s1248_s26 = scalar_lea.hbm %s1499_s18, 512  ;;  %s1252_s17 = scalar_lea.hbm %s1582_s8, 1024 }
 0x320   : > { %p1249_p10 = scmp.ne.s32.totalorder %s1499_s18, %s1248_s26  ;;  %p1253_p13 = scmp.lt.u32.totalorder %s1499_s18, %s1582_s8 }
 0x321   : > { %p1254_p0 = scmp.lt.u32.totalorder %s1252_s17, %s1248_s26  ;;  %p1256_p2 = scmp.lt.u32.totalorder %s1248_s26, %s1499_s18 }
 0x322   : > { %p1250_p11 = pnand %p1249_p10, %p1393_p5 }
 0x323   : > { %p1255_p1 = por %p1254_p0, %p1253_p13 }
 0x324   : > { %p1251_p12 = pneg %p1250_p11 }
 0x325   : > { %p1257_p3 = por %p1256_p2, %p1255_p1 }
 0x327   : > { %p1258_p4 = pnand %p1257_p3, %p1251_p12 }
 0x329   : > { %1261 = shalt.err (!%p1258_p4)
}
 0x32a   : > { %1131 = dma.vmem_to_hbm [thread:$0]  (%p1393_p5), %s1485_s23, 512, %s1499_s18, %s919_s10, %s1307_s0, %s1307_s0, %s1308_s21  }
 0x32b PF: > { %p1141_p7 = scmp.ge.s32.totalorder %s1300_s30, 2  ;;  %s963_s22 = sand.u32 1, %s1288_s27  }
 0x32c   : > { %s964_s25 = scalar_lea.sflag [#allocation4], %s963_s22 }
 0x32d   : > { %p1135_p8 = pnand %p1141_p7, %p1397_p6 }
 0x32f   : > { %1279 = dma.done.wait (!%p1135_p8), %s964_s25, 512  }
 0x330   : > { %1281 = vsyncadd (!%p1135_p8), %s964_s25, 4294966784  ;;  %s973_s15 = scalar_lea.sflag [#allocation6], %s963_s22 }
 0x331   : > { %1283 = dma.done.wait (!%p1135_p8), %s973_s15, 512  }
 0x332   : > { %1285 = vsyncadd (!%p1135_p8), %s973_s15, 4294966784  ;;  %p22_p5 = scmp.ge.s32.totalorder %s1380_s11, 4   ;;  %s1587_s27 = smov %s1292_s28 }
 0x333   : > { %s1588_s28 = smov %s1296_s29  ;;  %s1589_s29 = smov %s1391_s14 }
 0x334   : > { %s1590_s30 = smov %s1380_s11  ;;  %24 = sbr.rel (!%p22_p5) target bundleno = 7 (0x7), region = 121 }
 0x33b   :  { %978 = vsyncpa [#allocation4], 1 }
 0x33c   :  { %980 = vsyncpa [#allocation4 + $0x1], 1 }
 0x33d   :  { %981 = vsyncpa [#allocation6], 1 }
 0x33e   :  { %983 = vsyncpa [#allocation6 + $0x1], 1 }

</bundles_post_ra>
